<compile_context>
chip_gen: v7x
topology: tpu7x:2x2x1
jax: 0.10.0
libtpu: 0.0.40
codegen_flags: <defaults>
</compile_context>

<pallas_src>
import functools

import jax
import jax.numpy as jnp
from jax.experimental import pallas as pl
from jax.experimental.pallas import tpu as pltpu


_DROPOUT_PS = (0.4, 0.3, 0.2)   # f.dropout rates after fc1 / fc2 / fc3
_NEG_SLOPE = 0.01               # f.leaky_relu default negative_slope


def _round_up(x, m):
    return ((x + m - 1) // m) * m


# ----------------------------- Pallas kernel --------------------------------

def _qnet_kernel(x_ref, w_ref, b_ref, u_ref, o_ref, *, training):
    """Fused 4x(Linear -> LeakyReLU) with inverted dropout after layers 1-3.

    x_ref : (block_b, Dp)      zero-padded input activations
    w_ref : (4, Dp, Dp)        zero-padded weights (in, out layout), resident
    b_ref : (4, Dp)            zero-padded biases, resident
    u_ref : (3, block_b, Dp)   f32 uniforms in [0, 1) for the 3 dropout layers
    o_ref : (block_b, Dp)      padded output; first out_dim lanes are valid
    """
    h = x_ref[...]
    for layer in range(4):                       # unrolled at trace time
        w = w_ref[layer]                         # (Dp, Dp) static-index view
        b = b_ref[layer:layer + 1, :]            # (1, Dp)
        h = jnp.dot(h, w, preferred_element_type=jnp.float32) + b
        h = jnp.where(h >= 0.0, h, jnp.float32(_NEG_SLOPE) * h)
        if training and layer < 3:
            keep = 1.0 - _DROPOUT_PS[layer]
            mask = u_ref[layer] < jnp.float32(keep)                   # 1 compare
            h = jnp.where(mask, h * jnp.float32(1.0 / keep), 0.0)     # 1 select
    o_ref[...] = h.astype(o_ref.dtype)


# ------------------------------- wrapper -------------------------------------

def pack_params(params, lane_pad):
    """Pack (w1,b1,...,w4,b4) into (4, Dp, Dp) weights + (4, Dp) biases.

    Zero padding keeps padded lanes identically zero through the whole net
    (zero weight rows/cols, zero bias, leaky_relu(0)=0, dropout(0)=0).
    """
    ws, bs = [], []
    for i in range(4):
        w = jnp.asarray(params[2 * i], jnp.float32)           # (in, out)
        b = jnp.asarray(params[2 * i + 1], jnp.float32).reshape(-1)
        wp = jnp.zeros((lane_pad, lane_pad), jnp.float32)
        wp = wp.at[: w.shape[0], : w.shape[1]].set(w)
        bp = jnp.zeros((lane_pad,), jnp.float32).at[: b.shape[0]].set(b)
        ws.append(wp)
        bs.append(bp)
    return jnp.stack(ws), jnp.stack(bs)


def qnetwork_forward(x, params, key, *, num_agent, action_space,
                     training=True, block_b=512):
    """x: (B, state_space*num_agent) f32 -> (B, num_agent, action_space) f32."""
    x = jnp.asarray(x, jnp.float32)
    batch, d_in = x.shape
    out_dim = num_agent * action_space

    dims = [d_in] + [int(params[2 * i].shape[1]) for i in range(4)]
    lane_pad = _round_up(max(dims), 128)         # common lane-dense width (128 here)

    w_packed, b_packed = pack_params(params, lane_pad)

    # Batch tiling: block must be a multiple of 8; pad batch to a whole grid.
    block_b = max(8, min(_round_up(batch, 8), _round_up(block_b, 8)))
    b_pad = _round_up(batch, block_b)
    x_pad = jnp.zeros((b_pad, lane_pad), jnp.float32).at[:batch, :d_in].set(x)

    # One host-side draw covers all three dropout layers (kernel just slices).
    uniforms = jax.random.uniform(key, (3, b_pad, lane_pad), jnp.float32)

    kernel = functools.partial(_qnet_kernel, training=training)

    out_pad = pl.pallas_call(
        kernel,
        out_shape=jax.ShapeDtypeStruct((b_pad, lane_pad), jnp.float32),
        grid=(b_pad // block_b,),
        in_specs=[
            pl.BlockSpec((block_b, lane_pad), lambda i: (i, 0)),          # x tile
            pl.BlockSpec((4, lane_pad, lane_pad), lambda i: (0, 0, 0)),   # packed W (resident)
            pl.BlockSpec((4, lane_pad), lambda i: (0, 0)),                # packed b (resident)
            pl.BlockSpec((3, block_b, lane_pad), lambda i: (0, i, 0)),    # dropout uniforms
        ],
        out_specs=pl.BlockSpec((block_b, lane_pad), lambda i: (i, 0)),
        compiler_params=pltpu.CompilerParams(
            dimension_semantics=("parallel",)),
    )(x_pad, w_packed, b_packed, uniforms)

    out = out_pad[:batch, :out_dim]
    return out.reshape(-1, num_agent, action_space)   # == x.view(-1, A, S)


# --------------------------- deterministic params ----------------------------

def init_linear(key, fan_in, fan_out):
    """torch.nn.Linear default init: U(-1/sqrt(fan_in), 1/sqrt(fan_in))."""
    kw, kb = jax.random.split(key)
    bound = 1.0 / (fan_in ** 0.5)
    w = jax.random.uniform(kw, (fan_in, fan_out), jnp.float32, -bound, bound)
    b = jax.random.uniform(kb, (fan_out,), jnp.float32, -bound, bound)
    return w, b


if __name__ == "__main__":
    # configs consistent with the module's __init__
    configs = {
        "tl_rl_list": ["tl_0", "tl_1"],   # num_agent = 2
        "state_space": 16,
        "action_space": 4,
        "fc_net": [32, 32, 32],
    }
    num_agent = len(configs["tl_rl_list"])
    state_space = configs["state_space"]
    action_space = configs["action_space"]
    fc = configs["fc_net"]

    d_in = state_space * num_agent                 # 32
    d1, d2, d3 = (w * num_agent for w in fc)       # 64, 64, 64
    d_out = action_space * num_agent               # 8

    key = jax.random.PRNGKey(0)
    k_x, k1, k2, k3, k4, k_drop = jax.random.split(key, 6)

    batch = 4
    x = jax.random.normal(k_x, (batch, d_in), jnp.float32)

    w1, b1 = init_linear(k1, d_in, d1)
    w2, b2 = init_linear(k2, d1, d2)
    w3, b3 = init_linear(k3, d2, d3)
    w4, b4 = init_linear(k4, d3, d_out)
    params = (w1, b1, w2, b2, w3, b3, w4, b4)

    # ---- deterministic check (dropout off) against a pure-JAX reference ----
    def ref_forward(xx):
        h = xx
        for w, b in ((w1, b1), (w2, b2), (w3, b3), (w4, b4)):
            h = jnp.dot(h, w) + b
            h = jnp.where(h >= 0.0, h, 0.01 * h)
        return h.reshape(-1, num_agent, action_space)

    out_eval = qnetwork_forward(x, params, k_drop, num_agent=num_agent,
                                action_space=action_space, training=False)
    out_eval = jax.block_until_ready(out_eval)
    ref = jax.block_until_ready(ref_forward(x))
    assert out_eval.shape == (batch, num_agent, action_space), out_eval.shape
    assert jnp.allclose(out_eval, ref, atol=2e-2, rtol=2e-2), \
        float(jnp.max(jnp.abs(out_eval - ref)))

    # ---- training-mode call (stochastic inverted dropout, f.dropout default) ----
    # NOTE: vary `k_drop` per training step to get fresh dropout masks.
    out_train = qnetwork_forward(x, params, k_drop, num_agent=num_agent,
                                 action_space=action_space, training=True)
    out_train = jax.block_until_ready(out_train)
    assert out_train.shape == (batch, num_agent, action_space)
    assert out_train.dtype == jnp.float32
    assert bool(jnp.all(jnp.isfinite(out_train)))

    print("KERNEL_OK")
</pallas_src>

<mosaic_0001>
module attributes {stable_mosaic.version = 11 : i64} {
  func.func @_qnet_kernel(%arg0: i32, %arg1: memref<8x128xf32, #tpu.memory_space<vmem>>, %arg2: memref<4x128x128xf32, #tpu.memory_space<vmem>>, %arg3: memref<4x128xf32, #tpu.memory_space<vmem>>, %arg4: memref<3x8x128xf32, #tpu.memory_space<vmem>>, %arg5: memref<8x128xf32, #tpu.memory_space<vmem>>) attributes {dimension_semantics = [#tpu.dimension_semantics<parallel>], iteration_bounds = array<i64: 1>, scalar_prefetch = 0 : i64, scratch_operands = 0 : i64, tpu.core_type = #tpu.core_type<tc>, window_params = [{transform_indices = @transform_0, window_bounds = array<i64: 8, 128>}, {pipeline_mode = #tpu.pipeline_mode<synchronous>, transform_indices = @transform_1, window_bounds = array<i64: 4, 128, 128>}, {pipeline_mode = #tpu.pipeline_mode<synchronous>, transform_indices = @transform_2, window_bounds = array<i64: 4, 128>}, {transform_indices = @transform_3, window_bounds = array<i64: 3, 8, 128>}, {transform_indices = @transform_4, window_bounds = array<i64: 8, 128>}]} {
    %c0 = arith.constant 0 : index
    %c0_0 = arith.constant 0 : index
    %0 = vector.load %arg1[%c0, %c0_0] : memref<8x128xf32, #tpu.memory_space<vmem>>, vector<8x128xf32>
    %c0_1 = arith.constant 0 : index
    %c0_2 = arith.constant 0 : index
    %c0_3 = arith.constant 0 : index
    %1 = vector.load %arg2[%c0_1, %c0_2, %c0_3] : memref<4x128x128xf32, #tpu.memory_space<vmem>>, vector<1x128x128xf32>
    %2 = vector.shape_cast %1 : vector<1x128x128xf32> to vector<128x128xf32>
    %c0_4 = arith.constant 0 : index
    %c0_5 = arith.constant 0 : index
    %3 = vector.load %arg3[%c0_4, %c0_5] : memref<4x128xf32, #tpu.memory_space<vmem>>, vector<1x128xf32>
    %cst = arith.constant dense<0.000000e+00> : vector<8x128xf32>
    %4 = tpu.matmul %0, %2, %cst {dimension_numbers = #tpu.dot_dimension_numbers<[1], [0], [0], [1], [0, 0, 1, 1], [], []>} : vector<8x128xf32>, vector<128x128xf32>, vector<8x128xf32> -> vector<8x128xf32>
    %5 = vector.broadcast %3 : vector<1x128xf32> to vector<8x128xf32>
    %6 = arith.addf %4, %5 : vector<8x128xf32>
    %cst_6 = arith.constant 0.000000e+00 : f32
    %7 = vector.broadcast %cst_6 : f32 to vector<8x128xf32>
    %8 = arith.cmpf oge, %6, %7 : vector<8x128xf32>
    %cst_7 = arith.constant 0.00999999977 : f32
    %9 = vector.broadcast %cst_7 : f32 to vector<8x128xf32>
    %10 = arith.mulf %9, %6 : vector<8x128xf32>
    %11 = arith.select %8, %6, %10 : vector<8x128xi1>, vector<8x128xf32>
    %c1 = arith.constant 1 : index
    %c0_8 = arith.constant 0 : index
    %c0_9 = arith.constant 0 : index
    %12 = vector.load %arg2[%c1, %c0_8, %c0_9] : memref<4x128x128xf32, #tpu.memory_space<vmem>>, vector<1x128x128xf32>
    %13 = vector.shape_cast %12 : vector<1x128x128xf32> to vector<128x128xf32>
    %c1_10 = arith.constant 1 : index
    %c0_11 = arith.constant 0 : index
    %14 = vector.load %arg3[%c1_10, %c0_11] : memref<4x128xf32, #tpu.memory_space<vmem>>, vector<1x128xf32>
    %cst_12 = arith.constant dense<0.000000e+00> : vector<8x128xf32>
    %15 = tpu.matmul %11, %13, %cst_12 {dimension_numbers = #tpu.dot_dimension_numbers<[1], [0], [0], [1], [0, 0, 1, 1], [], []>} : vector<8x128xf32>, vector<128x128xf32>, vector<8x128xf32> -> vector<8x128xf32>
    %16 = vector.broadcast %14 : vector<1x128xf32> to vector<8x128xf32>
    %17 = arith.addf %15, %16 : vector<8x128xf32>
    %cst_13 = arith.constant 0.000000e+00 : f32
    %18 = vector.broadcast %cst_13 : f32 to vector<8x128xf32>
    %19 = arith.cmpf oge, %17, %18 : vector<8x128xf32>
    %cst_14 = arith.constant 0.00999999977 : f32
    %20 = vector.broadcast %cst_14 : f32 to vector<8x128xf32>
    %21 = arith.mulf %20, %17 : vector<8x128xf32>
    %22 = arith.select %19, %17, %21 : vector<8x128xi1>, vector<8x128xf32>
    %c2 = arith.constant 2 : index
    %c0_15 = arith.constant 0 : index
    %c0_16 = arith.constant 0 : index
    %23 = vector.load %arg2[%c2, %c0_15, %c0_16] : memref<4x128x128xf32, #tpu.memory_space<vmem>>, vector<1x128x128xf32>
    %24 = vector.shape_cast %23 : vector<1x128x128xf32> to vector<128x128xf32>
    %c2_17 = arith.constant 2 : index
    %c0_18 = arith.constant 0 : index
    %25 = vector.load %arg3[%c2_17, %c0_18] : memref<4x128xf32, #tpu.memory_space<vmem>>, vector<1x128xf32>
    %cst_19 = arith.constant dense<0.000000e+00> : vector<8x128xf32>
    %26 = tpu.matmul %22, %24, %cst_19 {dimension_numbers = #tpu.dot_dimension_numbers<[1], [0], [0], [1], [0, 0, 1, 1], [], []>} : vector<8x128xf32>, vector<128x128xf32>, vector<8x128xf32> -> vector<8x128xf32>
    %27 = vector.broadcast %25 : vector<1x128xf32> to vector<8x128xf32>
    %28 = arith.addf %26, %27 : vector<8x128xf32>
    %cst_20 = arith.constant 0.000000e+00 : f32
    %29 = vector.broadcast %cst_20 : f32 to vector<8x128xf32>
    %30 = arith.cmpf oge, %28, %29 : vector<8x128xf32>
    %cst_21 = arith.constant 0.00999999977 : f32
    %31 = vector.broadcast %cst_21 : f32 to vector<8x128xf32>
    %32 = arith.mulf %31, %28 : vector<8x128xf32>
    %33 = arith.select %30, %28, %32 : vector<8x128xi1>, vector<8x128xf32>
    %c3 = arith.constant 3 : index
    %c0_22 = arith.constant 0 : index
    %c0_23 = arith.constant 0 : index
    %34 = vector.load %arg2[%c3, %c0_22, %c0_23] : memref<4x128x128xf32, #tpu.memory_space<vmem>>, vector<1x128x128xf32>
    %35 = vector.shape_cast %34 : vector<1x128x128xf32> to vector<128x128xf32>
    %c3_24 = arith.constant 3 : index
    %c0_25 = arith.constant 0 : index
    %36 = vector.load %arg3[%c3_24, %c0_25] : memref<4x128xf32, #tpu.memory_space<vmem>>, vector<1x128xf32>
    %cst_26 = arith.constant dense<0.000000e+00> : vector<8x128xf32>
    %37 = tpu.matmul %33, %35, %cst_26 {dimension_numbers = #tpu.dot_dimension_numbers<[1], [0], [0], [1], [0, 0, 1, 1], [], []>} : vector<8x128xf32>, vector<128x128xf32>, vector<8x128xf32> -> vector<8x128xf32>
    %38 = vector.broadcast %36 : vector<1x128xf32> to vector<8x128xf32>
    %39 = arith.addf %37, %38 : vector<8x128xf32>
    %cst_27 = arith.constant 0.000000e+00 : f32
    %40 = vector.broadcast %cst_27 : f32 to vector<8x128xf32>
    %41 = arith.cmpf oge, %39, %40 : vector<8x128xf32>
    %cst_28 = arith.constant 0.00999999977 : f32
    %42 = vector.broadcast %cst_28 : f32 to vector<8x128xf32>
    %43 = arith.mulf %42, %39 : vector<8x128xf32>
    %44 = arith.select %41, %39, %43 : vector<8x128xi1>, vector<8x128xf32>
    %c0_29 = arith.constant 0 : index
    %c0_30 = arith.constant 0 : index
    %45 = vector.load %arg5[%c0_29, %c0_30] : memref<8x128xf32, #tpu.memory_space<vmem>>, vector<8x128xf32>
    tpu.vector_store %arg5[%c0_29, %c0_30], %44 {strides = array<i32>} : memref<8x128xf32, #tpu.memory_space<vmem>>, vector<8x128xf32>,
    return
  }
  func.func @transform_0(%arg0: i32) -> (i32, i32) {
    %c0_i32 = arith.constant 0 : i32
    %c0_i32_0 = arith.constant 0 : i32
    return %arg0, %c0_i32 : i32, i32
  }
  func.func @transform_1(%arg0: i32) -> (i32, i32, i32) {
    %c0_i32 = arith.constant 0 : i32
    %c0_i32_0 = arith.constant 0 : i32
    %c0_i32_1 = arith.constant 0 : i32
    %c0_i32_2 = arith.constant 0 : i32
    return %c0_i32, %c0_i32_0, %c0_i32_1 : i32, i32, i32
  }
  func.func @transform_2(%arg0: i32) -> (i32, i32) {
    %c0_i32 = arith.constant 0 : i32
    %c0_i32_0 = arith.constant 0 : i32
    %c0_i32_1 = arith.constant 0 : i32
    return %c0_i32, %c0_i32_0 : i32, i32
  }
  func.func @transform_3(%arg0: i32) -> (i32, i32, i32) {
    %c0_i32 = arith.constant 0 : i32
    %c0_i32_0 = arith.constant 0 : i32
    %c0_i32_1 = arith.constant 0 : i32
    return %c0_i32, %arg0, %c0_i32_0 : i32, i32, i32
  }
  func.func @transform_4(%arg0: i32) -> (i32, i32) {
    %c0_i32 = arith.constant 0 : i32
    %c0_i32_0 = arith.constant 0 : i32
    return %arg0, %c0_i32 : i32, i32
  }
}

</mosaic_0001>

<bundles_post_ra>
// kernel: tpu_custom_call.1
= control target key start
LH: loop header
LB: loop body
LE: loop exit
PB: predicated region body
PF: predicated region fallthrough
CT: control target
= control target key end

     0   :  { %9 = vsyncpa [#allocation3], 0  ;;  %s1005_s0 = inlined_call_operand.hbm [shape: f32[8,128], index: 0, kind: input, shape index: {}]   ;;  %s1006_s1 = inlined_call_operand.hbm [shape: f32[4,128,128], index: 1, kind: input, shape index: {}]   ;;  %s1007_s2 = inlined_call_operand.vmem [shape: f32[4,128], index: 2, kind: input, shape index: {}]   ;;  %s1008_s3 = inlined_call_operand.hbm [shape: f32[3,8,128], index: 3, kind: input, shape index: {}]   ;;  %s1009_s4 = inlined_call_operand.hbm [shape: f32[8,128], index: 4, kind: output, shape index: {}]  }
   0x1   :  { %10 = vsyncpa [#allocation6], 0 }
   0x2   :  { %11 = vsyncpa [#allocation4], 0  ;;  %s865_s15 = smov [#allocation5]   ;;  %s771_s19 = scalar_lea.hbm %s1006_s1, 8192 }
   0x3   :  { %s27_s16 = sshll.u32 %s865_s15, 4  ;;  %p772_p0 = scmp.ne.s32.totalorder %s1006_s1, %s771_s19  ;;  %s28_s16 = int_to_ptr.vmem [resolvable:$true] %s27_s16 }
   0x4   :  { %p775_p1 = scmp.lt.u32.totalorder %s771_s19, %s1006_s1 }
   0x6   :  { %p777_p2 = pnand %p775_p1, %p772_p0 }
   0x8   :  { %780 = shalt.err (!%p777_p2)
}
   0x9   :  { %s781_s24 = scalar_lea.vmem %s28_s16, 8192  ;;  %p786_p4 = scmp.lt.s32.totalorder %s28_s16, %s28_s16 }
   0xa   :  { %p782_p3 = scmp.ne.s32.totalorder %s28_s16, %s781_s24  ;;  %p787_p5 = scmp.lt.s32.totalorder %s781_s24, %s781_s24 }
   0xc   :  { %p788_p6 = por %p787_p5, %p786_p4 }
   0xe   :  { %p789_p7 = pnand %p788_p6, %p782_p3 }
  0x10   :  { %792 = shalt.err (!%p789_p7)
}
  0x11   :  { %s866_s25 = smov 128   ;;  %s867_s26 = smov 8  }
  0x12   :  { %33 = dma.hbm_to_vmem [thread:$0]  %s1006_s1, 8192, %s28_s16, [#allocation6], %s866_s25, %s866_s25, %s867_s26  }
  0x13   :  { %s868_s29 = smov [#allocation2]   ;;  %s869_s5 = smov [#allocation7]  }
  0x14   :  { %s18_s30 = sshll.u32 %s868_s29, 4  ;;  %s41_s6 = sshll.u32 %s869_s5, 4  ;;  %s19_s30 = int_to_ptr.vmem [resolvable:$true] %s18_s30  ;;  %s42_s6 = int_to_ptr.vmem [resolvable:$true] %s41_s6 }
  0x15   :  { %s793_s9 = scalar_lea.hbm %s1005_s0, 128 }
  0x16   :  { %p794_p8 = scmp.ne.s32.totalorder %s1005_s0, %s793_s9  ;;  %p797_p9 = scmp.lt.u32.totalorder %s793_s9, %s1005_s0 }
  0x18   :  { %p799_p10 = pnand %p797_p9, %p794_p8 }
  0x1a   :  { %802 = shalt.err (!%p799_p10)
}
  0x1b   :  { %s803_s1 = scalar_lea.vmem %s19_s30, 128  ;;  %p808_p12 = scmp.lt.s32.totalorder %s19_s30, %s19_s30 }
  0x1c   :  { %p804_p11 = scmp.ne.s32.totalorder %s19_s30, %s803_s1  ;;  %p809_p13 = scmp.lt.s32.totalorder %s803_s1, %s803_s1 }
  0x1e   :  { %p810_p0 = por %p809_p13, %p808_p12 }
  0x20   :  { %p811_p1 = pnand %p810_p0, %p804_p11 }
  0x22   :  { %814 = shalt.err (!%p811_p1)
}
  0x23   :  { %21 = dma.hbm_to_vmem [thread:$0]  %s1005_s0, 128, %s19_s30, [#allocation3]  }
  0x24   :  { %s815_s18 = scalar_lea.hbm %s1008_s3, 384 }
  0x25   :  { %p816_p2 = scmp.ne.s32.totalorder %s1008_s3, %s815_s18  ;;  %p819_p3 = scmp.lt.u32.totalorder %s815_s18, %s1008_s3 }
  0x27   :  { %p821_p4 = pnand %p819_p3, %p816_p2 }
  0x29   :  { %824 = shalt.err (!%p821_p4)
}
  0x2a   :  { %s825_s23 = scalar_lea.vmem %s42_s6, 384  ;;  %p830_p6 = scmp.lt.s32.totalorder %s42_s6, %s42_s6 }
  0x2b   :  { %p826_p5 = scmp.ne.s32.totalorder %s42_s6, %s825_s23  ;;  %p831_p7 = scmp.lt.s32.totalorder %s825_s23, %s825_s23 }
  0x2d   :  { %p832_p8 = por %p831_p7, %p830_p6 }
  0x2f   :  { %p833_p9 = pnand %p832_p8, %p826_p5 }
  0x31   :  { %836 = shalt.err (!%p833_p9)
}
  0x32   :  { %47 = dma.hbm_to_vmem [thread:$0]  %s1008_s3, 384, %s42_s6, [#allocation6], %s866_s25, %s866_s25, %s867_s26  }
  0x33   :  { %859 = dma.done.wait [#allocation3], 128  }
  0x34   :  { %860 = vsyncadd [#allocation3], 4294967168 }
  0x35   :  { %861 = dma.done.wait [#allocation6], 8576  }
  0x36   :  { %862 = vsyncadd [#allocation6], 4294958720  ;;  %v870_v0 = vmov 0.0|0.0   ;;  %vm871_vm0 = vmmov 0   ;;  %v872_v1 = vmov 0.0   ;;  %v58_v2 = vld [vmem:[#allocation5] sm:$0xff] }
  0x37   :  { %666 = vmatprep.subr.bf16.mxu0 %v870_v0  ;;  %558 = vmatprep.mubr.msk.f32.mxu0 %vm871_vm0, %v872_v1  ;;  %v59_v3 = vld [vmem:[#allocation5 + $0x8] sm:$0xff]  ;;  %v60_v4 = vld [vmem:[#allocation5 + $0x10] sm:$0xff]  ;;  %v61_v6 = vld [vmem:[#allocation5 + $0x18] sm:$0xff]  ;;  %s873_s6 = smov [#allocation8]  }
  0x38   :  { %690 = vmatprep.subr.bf16.mxu1 %v870_v0  ;;  %593 = vmatprep.mubr.msk.f32.mxu1 %vm871_vm0, %v872_v1  ;;  %v667_v5 = vpack.c.bf16 %v59_v3, %v58_v2  ;;  %v670_v7 = vpack.c.bf16 %v61_v6, %v60_v4  ;;  %v62_v8 = vld [vmem:[#allocation5 + $0x20] sm:$0xff]  ;;  %v63_v9 = vld [vmem:[#allocation5 + $0x28] sm:$0xff]  ;;  %v155_v12 = vld [vmem:[#allocation5 + $0x90] sm:$0xff]  ;;  %s444_s7 = sshll.u32 %s873_s6, 4  ;;  %s445_s7 = int_to_ptr.vmem [resolvable:$true] %s444_s7 }
  0x39   :  { %v153_v10 = vld [vmem:[#allocation5 + $0x80] sm:$0xff]  ;;  %v154_v11 = vld [vmem:[#allocation5 + $0x88] sm:$0xff]  ;;  %v156_v13 = vld [vmem:[#allocation5 + $0x98] sm:$0xff]  ;;  %v673_v14 = vpack.c.bf16 %v63_v9, %v62_v8  ;;  %s837_s8 = scalar_lea.vmem %s445_s7, 128  ;;  %p842_p11 = scmp.lt.s32.totalorder %s445_s7, %s445_s7 }
  0x3a   :  { %668 = vmatpush3.bf16.msra.mxu0 %v667_v5  ;;  %v691_v15 = vpack.c.bf16 %v154_v11, %v153_v10  ;;  %v64_v16 = vld [vmem:[#allocation5 + $0x30] sm:$0xff]  ;;  %v65_v17 = vld [vmem:[#allocation5 + $0x38] sm:$0xff]  ;;  %v694_v18 = vpack.c.bf16 %v156_v13, %v155_v12  ;;  %v157_v19 = vld [vmem:[#allocation5 + $0xa0] sm:$0xff]  ;;  %p838_p10 = scmp.ne.s32.totalorder %s445_s7, %s837_s8  ;;  %p843_p12 = scmp.lt.s32.totalorder %s837_s8, %s837_s8 }
  0x3b   :  { %669 = vmatprep.subr.bf16.mxu0 %v870_v0  ;;  %v158_v20 = vld [vmem:[#allocation5 + $0xa8] sm:$0xff]  ;;  %v676_v21 = vpack.c.bf16 %v65_v17, %v64_v16  ;;  %v66_v22 = vld [vmem:[#allocation5 + $0x40] sm:$0xff]  ;;  %v159_v25 = vld [vmem:[#allocation5 + $0xb0] sm:$0xff] }
  0x3c   :  { %692 = vmatpush3.bf16.msra.mxu1 %v691_v15  ;;  %v67_v23 = vld [vmem:[#allocation5 + $0x48] sm:$0xff]  ;;  %v697_v24 = vpack.c.bf16 %v158_v20, %v157_v19  ;;  %v160_v26 = vld [vmem:[#allocation5 + $0xb8] sm:$0xff]  ;;  %v68_v28 = vld [vmem:[#allocation5 + $0x50] sm:$0xff]  ;;  %p844_p13 = por %p843_p12, %p842_p11 }
  0x3d   :  { %693 = vmatprep.subr.bf16.mxu1 %v870_v0  ;;  %v679_v27 = vpack.c.bf16 %v67_v23, %v66_v22  ;;  %v69_v29 = vld [vmem:[#allocation5 + $0x58] sm:$0xff]  ;;  %v700_v30 = vpack.c.bf16 %v160_v26, %v159_v25  ;;  %v161_v31 = vld [vmem:[#allocation5 + $0xc0] sm:$0xff]  ;;  %v162_v32 = vld [vmem:[#allocation5 + $0xc8] sm:$0xff] }
  0x3e   :  { %671 = vmatpush3.bf16.msra.mxu0 %v670_v7  ;;  %v682_v33 = vpack.c.bf16 %v69_v29, %v68_v28  ;;  %v70_v34 = vld [vmem:[#allocation5 + $0x60] sm:$0xff]  ;;  %v71_v35 = vld [vmem:[#allocation5 + $0x68] sm:$0xff]  ;;  %v703_v36 = vpack.c.bf16 %v162_v32, %v161_v31  ;;  %v163_v37 = vld [vmem:[#allocation5 + $0xd0] sm:$0xff]  ;;  %p845_p0 = pnand %p844_p13, %p838_p10 }
  0x3f   :  { %672 = vmatprep.subr.bf16.mxu0 %v870_v0  ;;  %v164_v38 = vld [vmem:[#allocation5 + $0xd8] sm:$0xff]  ;;  %v685_v39 = vpack.c.bf16 %v71_v35, %v70_v34  ;;  %v72_v40 = vld [vmem:[#allocation5 + $0x70] sm:$0xff]  ;;  %v165_v43 = vld [vmem:[#allocation5 + $0xe0] sm:$0xff] }
  0x40   :  { %695 = vmatpush3.bf16.msra.mxu1 %v694_v18  ;;  %v73_v41 = vld [vmem:[#allocation5 + $0x78] sm:$0xff]  ;;  %v706_v42 = vpack.c.bf16 %v164_v38, %v163_v37  ;;  %v166_v44 = vld [vmem:[#allocation5 + $0xe8] sm:$0xff]  ;;  %v167_v48 = vld [vmem:[#allocation5 + $0xf0] sm:$0xff] }
  0x41   :  { %696 = vmatprep.subr.bf16.mxu1 %v870_v0  ;;  %v688_v45 = vpack.c.bf16 %v73_v41, %v72_v40  ;;  %v709_v46 = vpack.c.bf16 %v166_v44, %v165_v43  ;;  %v57_v47 = vld [vmem:[#allocation2] sm:$0xff]  ;;  %v248_v51 = vld [vmem:[#allocation5 + $0x100] sm:$0xff]  ;;  %v249_v52 = vld [vmem:[#allocation5 + $0x108] sm:$0xff] }
  0x42   :  { %674 = vmatpush3.bf16.msra.mxu0 %v673_v14  ;;  %v168_v49 = vld [vmem:[#allocation5 + $0xf8] sm:$0xff]  ;;  %v250_v53 = vld [vmem:[#allocation5 + $0x110] sm:$0xff]  ;;  %v715_v54 = vpack.c.bf16 %v249_v52, %v248_v51  ;;  %v252_v57 = vld [vmem:[#allocation5 + $0x120] sm:$0xff] }
  0x43   :  { %675 = vmatprep.subr.bf16.mxu0 %v870_v0  ;;  %v712_v50 = vpack.c.bf16 %v168_v49, %v167_v48  ;;  %v251_v55 = vld [vmem:[#allocation5 + $0x118] sm:$0xff]  ;;  %v253_v58 = vld [vmem:[#allocation5 + $0x128] sm:$0xff]  ;;  %v254_v60 = vld [vmem:[#allocation5 + $0x130] sm:$0xff] }
  0x44   :  { %698 = vmatpush3.bf16.msra.mxu1 %v697_v24  ;;  %v718_v56 = vpack.c.bf16 %v251_v55, %v250_v53  ;;  %v721_v59 = vpack.c.bf16 %v253_v58, %v252_v57  ;;  %v255_v61 = vld [vmem:[#allocation5 + $0x138] sm:$0xff]  ;;  %v256_v63 = vld [vmem:[#allocation5 + $0x140] sm:$0xff]  ;;  %v257_v2 = vld [vmem:[#allocation5 + $0x148] sm:$0xff] }
  0x45   :  { %699 = vmatprep.subr.bf16.mxu1 %v870_v0  ;;  %v724_v62 = vpack.c.bf16 %v255_v61, %v254_v60  ;;  %v727_v3 = vpack.c.bf16 %v257_v2, %v256_v63  ;;  %v258_v4 = vld [vmem:[#allocation5 + $0x150] sm:$0xff]  ;;  %v259_v5 = vld [vmem:[#allocation5 + $0x158] sm:$0xff]  ;;  %v260_v7 = vld [vmem:[#allocation5 + $0x160] sm:$0xff] }
  0x46   :  { %677 = vmatpush3.bf16.msra.mxu0 %v676_v21  ;;  %v730_v6 = vpack.c.bf16 %v259_v5, %v258_v4  ;;  %v261_v8 = vld [vmem:[#allocation5 + $0x168] sm:$0xff]  ;;  %v454_v10 = vld [vmem:[%s1007_s2] ss:$0 sm:$0xff]  ;;  %v262_v16 = vld [vmem:[#allocation5 + $0x170] sm:$0xff] }
  0x47   :  { %678 = vmatprep.subr.bf16.mxu0 %v870_v0  ;;  %v733_v9 = vpack.c.bf16 %v261_v8, %v260_v7  ;;  %v263_v17 = vld [vmem:[#allocation5 + $0x178] sm:$0xff]  ;;  %v343_v19 = vld [vmem:[#allocation5 + $0x180] sm:$0xff]  ;;  %v344_v20 = vld [vmem:[#allocation5 + $0x188] sm:$0xff] }
  0x48   :  { %701 = vmatpush3.bf16.msra.mxu1 %v700_v30  ;;  %v736_v18 = vpack.c.bf16 %v263_v17, %v262_v16  ;;  %v345_v21 = vld [vmem:[#allocation5 + $0x190] sm:$0xff]  ;;  %v739_v22 = vpack.c.bf16 %v344_v20, %v343_v19  ;;  %v346_v23 = vld [vmem:[#allocation5 + $0x198] sm:$0xff]  ;;  %v347_v25 = vld [vmem:[#allocation5 + $0x1a0] sm:$0xff] }
  0x49   :  { %702 = vmatprep.subr.bf16.mxu1 %v870_v0  ;;  %v742_v24 = vpack.c.bf16 %v346_v23, %v345_v21  ;;  %v348_v26 = vld [vmem:[#allocation5 + $0x1a8] sm:$0xff]  ;;  %v350_v28 = vld [vmem:[#allocation5 + $0x1b8] sm:$0xff]  ;;  %v351_v30 = vld [vmem:[#allocation5 + $0x1c0] sm:$0xff] }
  0x4a   :  { %680 = vmatpush3.bf16.msra.mxu0 %v679_v27  ;;  %v745_v27 = vpack.c.bf16 %v348_v26, %v347_v25  ;;  %v352_v31 = vld [vmem:[#allocation5 + $0x1c8] sm:$0xff]  ;;  %v354_v34 = vld [vmem:[#allocation5 + $0x1d8] sm:$0xff] }
  0x4b   :  { %681 = vmatprep.subr.bf16.mxu0 %v870_v0  ;;  %v751_v32 = vpack.c.bf16 %v352_v31, %v351_v30  ;;  %v356_v37 = vld [vmem:[#allocation5 + $0x1e8] sm:$0xff]  ;;  %v456_v48 = vld [vmem:[%s1007_s2 + $0x2] ss:$0 sm:$0xff]  ;;  %v457_v53 = vld [vmem:[%s1007_s2 + $0x3] ss:$0 sm:$0xff] }
  0x4c   :  { %704 = vmatpush3.bf16.msra.mxu1 %v703_v36  ;;  %v355_v36 = vld [vmem:[#allocation5 + $0x1e0] sm:$0xff] }
  0x4d   :  { %705 = vmatprep.subr.bf16.mxu1 %v870_v0  ;;  %v757_v38 = vpack.c.bf16 %v356_v37, %v355_v36 }
  0x4e   :  { %683 = vmatpush3.bf16.msra.mxu0 %v682_v33  ;;  %v353_v33 = vld [vmem:[#allocation5 + $0x1d0] sm:$0xff] }
  0x4f   :  { %684 = vmatprep.subr.bf16.mxu0 %v870_v0  ;;  %v754_v35 = vpack.c.bf16 %v354_v34, %v353_v33 }
  0x50   :  { %707 = vmatpush3.bf16.msra.mxu1 %v706_v42 }
  0x51   :  { %708 = vmatprep.subr.bf16.mxu1 %v870_v0 }
  0x52   :  { %686 = vmatpush3.bf16.msra.mxu0 %v685_v39  ;;  %v455_v39 = vld [vmem:[%s1007_s2 + $0x1] ss:$0 sm:$0xff] }
  0x53   :  { %687 = vmatprep.subr.bf16.mxu0 %v870_v0 }
  0x54   :  { %710 = vmatpush3.bf16.msra.mxu1 %v709_v46  ;;  %v358_v46 = vld [vmem:[#allocation5 + $0x1f8] sm:$0xff] }
  0x55   :  { %711 = vmatprep.subr.bf16.mxu1 %v870_v0 }
  0x56   :  { %689 = vmatpush3.bf16.msra.mxu0 %v688_v45  ;;  %v357_v45 = vld [vmem:[#allocation5 + $0x1f0] sm:$0xff] }
  0x57   :  { %714 = vmatprep.subr.bf16.mxu0 %v870_v0 }
  0x58   :  { %713 = vmatpush3.bf16.msra.mxu1 %v712_v50 }
  0x59   :  { %559 = vmatmul.mubr.f32.vlgmr.msra.gmra.mrb[0].mxu0 %v57_v47  ;;  %738 = vmatprep.subr.bf16.mxu1 %v870_v0  ;;  %v760_v47 = vpack.c.bf16 %v358_v46, %v357_v45 }
  0x5a   :  { %628 = vmatprep.mubr.msk.f32.mxu0 %vm871_vm0, %v872_v1  ;;  %716 = vmatpush3.bf16.msra.mxu0 %v715_v54 }
  0x5b   :  { %717 = vmatprep.subr.bf16.mxu0 %v870_v0 }
  0x5e   :  { %719 = vmatpush3.bf16.msra.mxu0 %v718_v56 }
  0x5f   :  { %720 = vmatprep.subr.bf16.mxu0 %v870_v0 }
  0x62   :  { %722 = vmatpush3.bf16.msra.mxu0 %v721_v59 }
  0x63   :  { %723 = vmatprep.subr.bf16.mxu0 %v870_v0 }
  0x66   :  { %725 = vmatpush3.bf16.msra.mxu0 %v724_v62 }
  0x67   :  { %726 = vmatprep.subr.bf16.mxu0 %v870_v0 }
  0x6a   :  { %728 = vmatpush3.bf16.msra.mxu0 %v727_v3 }
  0x6b   :  { %729 = vmatprep.subr.bf16.mxu0 %v870_v0 }
  0x6e   :  { %731 = vmatpush3.bf16.msra.mxu0 %v730_v6 }
  0x6f   :  { %732 = vmatprep.subr.bf16.mxu0 %v870_v0 }
  0x72   :  { %734 = vmatpush3.bf16.msra.mxu0 %v733_v9 }
  0x73   :  { %735 = vmatprep.subr.bf16.mxu0 %v870_v0 }
  0x76   :  { %737 = vmatpush3.bf16.msra.mxu0 %v736_v18 }
 0x12c   :  { %v145_v11 = vpop.f32.mrb[0].mxu0 }
 0x12d   :  { %v146_v12 = vadd.f32 %v454_v10, %v145_v11  ;;  %v560_v13 = vpop.f32.mrb[1].mxu0 }
 0x12f   :  { %v150_v14 = vmul.f32 0.01, %v146_v12  ;;  %vm149_vm1 = vcmp.ge.f32.partialorder %v146_v12, 0.0 }
 0x131   :  { %v151_v15 = vsel %vm149_vm1, %v146_v12, %v150_v14 }
 0x132   :  { %594 = vmatmul.mubr.f32.vlgmr.msra.gmra.mrb[0].mxu1 %v151_v15 }
 0x133   :  { %663 = vmatprep.mubr.msk.f32.mxu1 %vm871_vm0, %v872_v1  ;;  %740 = vmatpush3.bf16.msra.mxu1 %v739_v22  ;;  %v349_v1 = vld [vmem:[#allocation5 + $0x1b0] sm:$0xff] }
 0x134   :  { %741 = vmatprep.subr.bf16.mxu1 %v870_v0  ;;  %v748_v29 = vpack.c.bf16 %v350_v28, %v349_v1 }
 0x137   :  { %743 = vmatpush3.bf16.msra.mxu1 %v742_v24 }
 0x138   :  { %744 = vmatprep.subr.bf16.mxu1 %v870_v0 }
 0x13b   :  { %746 = vmatpush3.bf16.msra.mxu1 %v745_v27 }
 0x13c   :  { %747 = vmatprep.subr.bf16.mxu1 %v870_v0 }
 0x13f   :  { %749 = vmatpush3.bf16.msra.mxu1 %v748_v29 }
 0x140   :  { %750 = vmatprep.subr.bf16.mxu1 %v870_v0 }
 0x143   :  { %752 = vmatpush3.bf16.msra.mxu1 %v751_v32 }
 0x144   :  { %753 = vmatprep.subr.bf16.mxu1 %v870_v0 }
 0x147   :  { %755 = vmatpush3.bf16.msra.mxu1 %v754_v35 }
 0x148   :  { %756 = vmatprep.subr.bf16.mxu1 %v870_v0 }
 0x14b   :  { %758 = vmatpush3.bf16.msra.mxu1 %v757_v38 }
 0x14c   :  { %759 = vmatprep.subr.bf16.mxu1 %v870_v0 }
 0x14f   :  { %761 = vmatpush3.bf16.msra.mxu1 %v760_v47 }
 0x205   :  { %v240_v40 = vpop.f32.mrb[0].mxu1 }
 0x206   :  { %v241_v41 = vadd.f32 %v455_v39, %v240_v40  ;;  %v595_v42 = vpop.f32.mrb[1].mxu1 }
 0x208   :  { %vm244_vm2 = vcmp.ge.f32.partialorder %v241_v41, 0.0  ;;  %v245_v43 = vmul.f32 0.01, %v241_v41 }
 0x20a   :  { %v246_v44 = vsel %vm244_vm2, %v241_v41, %v245_v43 }
 0x20b   :  { %629 = vmatmul.mubr.f32.vlgmr.msra.gmra.mrb[2].mxu0 %v246_v44 }
 0x2de   :  { %v335_v0 = vpop.f32.mrb[2].mxu0 }
 0x2df   :  { %v336_v49 = vadd.f32 %v456_v48, %v335_v0  ;;  %v630_v50 = vpop.f32.mrb[3].mxu0 }
 0x2e1   :  { %vm339_vm3 = vcmp.ge.f32.partialorder %v336_v49, 0.0  ;;  %v340_v51 = vmul.f32 0.01, %v336_v49 }
 0x2e3   :  { %v341_v52 = vsel %vm339_vm3, %v336_v49, %v340_v51 }
 0x2e4   :  { %664 = vmatmul.mubr.f32.vlgmr.msra.gmra.mrb[2].mxu1 %v341_v52 }
 0x3b7   :  { %v430_v54 = vpop.f32.mrb[2].mxu1 }
 0x3b8   :  { %v431_v55 = vadd.f32 %v457_v53, %v430_v54  ;;  %v665_v56 = vpop.f32.mrb[3].mxu1 }
 0x3ba   :  { %v435_v57 = vmul.f32 0.01, %v431_v55  ;;  %vm434_vm4 = vcmp.ge.f32.partialorder %v431_v55, 0.0 }
 0x3bc   :  { %v436_v58 = vsel %vm434_vm4, %v431_v55, %v435_v57 }
 0x3bd   :  { %437 = vst [vmem:[#allocation8] sm:$0xff] %v436_v58 }
 0x3be   :  { %848 = shalt.err (!%p845_p0)
}
 0x3bf   :  { %s849_s2 = scalar_lea.hbm %s1009_s4, 128 }
 0x3c0   :  { %p850_p1 = scmp.ne.s32.totalorder %s1009_s4, %s849_s2  ;;  %p853_p2 = scmp.lt.u32.totalorder %s849_s2, %s1009_s4 }
 0x3c2   :  { %p855_p3 = pnand %p853_p2, %p850_p1 }
 0x3c4   :  { %858 = shalt.err (!%p855_p3)
}
 0x3c5   :  { %447 = dma.vmem_to_hbm [thread:$0]  %s445_s7, 128, %s1009_s4, [#allocation4]  }
 0x3c6   :  { %863 = dma.done.wait [#allocation4], 128  }
 0x3c7   :  { %864 = vsyncadd [#allocation4], 4294967168 }
 0x3c8   :  { %451 = vsyncpa [#allocation3], 1 }
 0x3c9   :  { %452 = vsyncpa [#allocation6], 1 }
 0x3ca   :  { %453 = vsyncpa [#allocation4], 1 }

</bundles_post_ra>
